<compile_context>
chip_gen: v5e
topology: v5e:2x2
jax: 0.10.0
libtpu: 0.0.40
codegen_flags: <defaults>
</compile_context>

<pallas_src>
import math

import jax
import jax.numpy as jnp
from jax.experimental import pallas as pl
from jax.experimental.pallas import tpu as pltpu


def _softmax_channel_kernel(x_ref, o_ref):
    # x_ref: (bN, C, TILE_HW) block in VMEM; softmax over the channel axis (axis=1).
    x = x_ref[...].astype(jnp.float32)
    m = jnp.max(x, axis=1, keepdims=True)
    e = jnp.exp(x - m)
    s = jnp.sum(e, axis=1, keepdims=True)
    # Exact reciprocal (VALU, not EUP) keeps results within 1e-6 of the
    # reference and leaves the EUP for exp (the likely critical unit on v7x).
    o_ref[...] = (e * pl.reciprocal(s, approx=False)).astype(o_ref.dtype)


_TARGET_BLOCK_BYTES = 2 * 1024 * 1024   # ~2 MiB per input block (>=85% of HBM roofline)
_MIN_LANES = 512                         # >= 2 KiB per strided HBM row
_MIN_GRID_STEPS = 8                      # keep both v7x TensorCores fed


def _choose_blocks(n, c, m, itemsize):
    """Pick (bN, lane_tile) for blocks of shape (bN, C, lane_tile).

    Policy: grow the lane tile first (long, lane-dense DMA bursts), then grow
    the batch block bN until the block reaches ~_TARGET_BLOCK_BYTES; finally
    trim bN / tile if that would collapse the grid below _MIN_GRID_STEPS.
    """
    row_bytes = max(1, c * itemsize)

    # Lane tile: multiple of 128 (or the full extent), as large as the budget allows.
    max_lanes = max(128, (_TARGET_BLOCK_BYTES // row_bytes) // 128 * 128)
    tile = m if m <= max_lanes else max_lanes

    # Batch block: only if the lane tile already covers all of M and the block
    # is still small (small-spatial regime, e.g. (N, C, 16, 16)).
    bn = 1
    if tile == m:
        block_bytes = row_bytes * tile
        if block_bytes < _TARGET_BLOCK_BYTES:
            bn = min(n, max(1, _TARGET_BLOCK_BYTES // max(1, block_bytes)))

    def nsteps(bn_, t_):
        return pl.cdiv(n, bn_) * pl.cdiv(m, t_)

    # Keep the grid reasonably deep for v7x megacore sharding (2 TCs).
    while bn > 1 and nsteps(bn, tile) < _MIN_GRID_STEPS:
        bn = max(1, bn // 2)
    while (nsteps(bn, tile) < _MIN_GRID_STEPS
           and tile % 256 == 0
           and tile // 2 >= min(m, _MIN_LANES)
           and tile // 2 >= 128):
        tile //= 2

    return bn, tile


def softmax_dim1(x):
    """Equivalent of nn.Softmax(dim=1) on a tensor with ndim >= 2 (e.g. NCHW)."""
    if x.ndim < 2:
        raise ValueError("expected at least 2-D input")
    N, C = int(x.shape[0]), int(x.shape[1])
    M = int(math.prod(x.shape[2:]))          # 1 if ndim == 2
    x3 = x.reshape(N, C, M)                  # free reshape (contiguous NCHW layout)

    bn, tile = _choose_blocks(N, C, M, x.dtype.itemsize)
    grid = (pl.cdiv(N, bn), pl.cdiv(M, tile))

    total = N * C * M
    cost = pl.CostEstimate(
        flops=5 * total,
        transcendentals=total,
        bytes_accessed=2 * total * x.dtype.itemsize,
    )

    y3 = pl.pallas_call(
        _softmax_channel_kernel,
        out_shape=jax.ShapeDtypeStruct((N, C, M), x.dtype),
        grid_spec=pltpu.PrefetchScalarGridSpec(
            num_scalar_prefetch=0,
            grid=grid,
            in_specs=[pl.BlockSpec((bn, C, tile), lambda i, j: (i, 0, j))],
            out_specs=pl.BlockSpec((bn, C, tile), lambda i, j: (i, 0, j)),
        ),
        compiler_params=pltpu.CompilerParams(
            dimension_semantics=("parallel", "parallel"),
            vmem_limit_bytes=32 * 1024 * 1024,
        ),
        cost_estimate=cost,
    )(x3)

    return y3.reshape(x.shape)


if __name__ == "__main__":
    key = jax.random.PRNGKey(0)
    x = jax.random.normal(key, (2, 4, 16, 16), dtype=jnp.float32)  # NCHW

    y = softmax_dim1(x)
    jax.block_until_ready(y)

    # Sanity checks against jax.nn.softmax over dim=1.
    y_ref = jax.nn.softmax(x, axis=1)
    assert y.shape == x.shape
    assert jnp.allclose(y, y_ref, atol=1e-6, rtol=1e-6)
    assert jnp.allclose(jnp.sum(y, axis=1), jnp.ones((2, 16, 16)), atol=1e-6)

    print("KERNEL_OK")
</pallas_src>

<mosaic_0001>
module attributes {stable_mosaic.version = 11 : i64} {
  func.func @_softmax_channel_kernel(%arg0: i32, %arg1: i32, %arg2: memref<1x4x256xf32, #tpu.memory_space<vmem>>, %arg3: memref<1x4x256xf32, #tpu.memory_space<vmem>>) attributes {dimension_semantics = [#tpu.dimension_semantics<parallel>, #tpu.dimension_semantics<parallel>], iteration_bounds = array<i64: 2, 1>, scalar_prefetch = 0 : i64, scratch_operands = 0 : i64, tpu.core_type = #tpu.core_type<tc>, window_params = [{transform_indices = @transform_0, window_bounds = array<i64: 1, 4, 256>}, {transform_indices = @transform_1, window_bounds = array<i64: 1, 4, 256>}]} {
    %c0 = arith.constant 0 : index
    %c0_0 = arith.constant 0 : index
    %c0_1 = arith.constant 0 : index
    %0 = vector.load %arg2[%c0, %c0_0, %c0_1] : memref<1x4x256xf32, #tpu.memory_space<vmem>>, vector<1x4x256xf32>
    %cst = arith.constant dense<0xFF800000> : vector<1x256xf32>
    %1 = vector.multi_reduction <maximumf>, %0, %cst [1] : vector<1x4x256xf32> to vector<1x256xf32>
    %2 = vector.shape_cast %1 : vector<1x256xf32> to vector<1x1x256xf32>
    %3 = vector.broadcast %2 : vector<1x1x256xf32> to vector<1x4x256xf32>
    %4 = arith.subf %0, %3 : vector<1x4x256xf32>
    %5 = math.exp %4 : vector<1x4x256xf32>
    %cst_2 = arith.constant dense<0.000000e+00> : vector<1x256xf32>
    %6 = vector.multi_reduction <add>, %5, %cst_2 [1] : vector<1x4x256xf32> to vector<1x256xf32>
    %7 = vector.shape_cast %6 : vector<1x256xf32> to vector<1x1x256xf32>
    %8 = tpu.reciprocal %7 : vector<1x1x256xf32> -> vector<1x1x256xf32>
    %9 = vector.broadcast %8 : vector<1x1x256xf32> to vector<1x4x256xf32>
    %10 = arith.mulf %5, %9 : vector<1x4x256xf32>
    %c0_3 = arith.constant 0 : index
    %c0_4 = arith.constant 0 : index
    %c0_5 = arith.constant 0 : index
    %11 = vector.load %arg3[%c0_3, %c0_4, %c0_5] : memref<1x4x256xf32, #tpu.memory_space<vmem>>, vector<1x4x256xf32>
    tpu.vector_store %arg3[%c0_3, %c0_4, %c0_5], %10 {strides = array<i32>} : memref<1x4x256xf32, #tpu.memory_space<vmem>>, vector<1x4x256xf32>,
    return
  }
  func.func @transform_0(%arg0: i32, %arg1: i32) -> (i32, i32, i32) {
    %c0_i32 = arith.constant 0 : i32
    %c0_i32_0 = arith.constant 0 : i32
    return %arg0, %c0_i32, %arg1 : i32, i32, i32
  }
  func.func @transform_1(%arg0: i32, %arg1: i32) -> (i32, i32, i32) {
    %c0_i32 = arith.constant 0 : i32
    %c0_i32_0 = arith.constant 0 : i32
    return %arg0, %c0_i32, %arg1 : i32, i32, i32
  }
}

</mosaic_0001>

<bundles_post_ra>
// kernel: tpu_custom_call.1
= control target key start
LH: loop header
LB: loop body
LE: loop exit
PB: predicated region body
PF: predicated region fallthrough
CT: control target
= control target key end

     0   :  { %6 = vsyncpa [#allocation3], 0  ;;  %s688_s0 = inlined_call_operand.hbm [shape: f32[2,4,256], index: 0, kind: input, shape index: {}]   ;;  %s689_s1 = inlined_call_operand.hbm [shape: f32[2,4,256], index: 1, kind: output, shape index: {}]  }
   0x1   :  { %8 = vsyncpa [#allocation3 + $0x1], 0 }
   0x2   :  { %9 = vsyncpa [#allocation4], 0 }
   0x3   :  { %11 = vsyncpa [#allocation4 + $0x1], 0  ;;  %s552_s6 = smov 0   ;;  %s554_s7 = smov 0  }
   0x4   :  { %s556_s8 = smov 0   ;;  %s558_s9 = smov 0  }
   0x5   :  { %s560_s10 = smov 0   ;;  %s562_s11 = smov 0  }
   0x6 LB: > { %s343_s12 = sadd.s32 4294967295, %s540_s11   ;;  %s344_s13 = sadd.s32 4294967294, %s540_s11   ;;  %s540_s11 = sphi %s562_s11, %s17_s11   ;;  %s536_s10 = sphi %s560_s10, %s700_s10   ;;  %s532_s9 = sphi %s558_s9, %s699_s9   ;;  %s528_s8 = sphi %s556_s8, %s698_s8   ;;  %s524_s7 = sphi %s554_s7, %s697_s7   ;;  %s520_s6 = sphi %s552_s6, %s696_s6  }
   0x7   : > { %s29_s14 = sadd.s32 1, %s536_s10  ;;  %s38_s15 = sadd.s32 1, %s528_s8 }
   0x8   : > { %p31_p0 = scmp.ge.s32.totalorder %s29_s14, 2  ;;  %p45_p1 = scmp.ne.s32.totalorder %s528_s8, %s524_s7 }
   0x9   : > { %p46_p2 = scmp.eq.s32.totalorder %s540_s11, 0  ;;  %p51_p3 = scmp.ne.s32.totalorder %s524_s7, %s520_s6 }
   0xa   : > { %s702_s14 = smov (%p31_p0, %s29_s14), 0  ;;  %p52_p5 = scmp.eq.s32.totalorder %s343_s12, 0 }
   0xb   : > { %p593_p4 = por %p46_p2, %p45_p1  ;;  %s33_s17 = ssub.s32 %s536_s10, %s702_s14 }
   0xc   : > { %p77_p6 = scmp.eq.s32.totalorder %s343_s12, 1  ;;  %p36_p7 = scmp.eq.s32.totalorder %s33_s17, 0 }
   0xd   : > { %p599_p8 = por %p52_p5, %p51_p3  ;;  %p83_p10 = scmp.eq.s32.totalorder %s344_s13, 1 }
   0xe   : > { %p603_p9 = por %p77_p6, %p45_p1  ;;  %p346_p12 = scmp.ge.s32.totalorder %s540_s11, 2 }
   0xf   : > { %s608_s20 = scalar_select %p36_p7, %s528_s8, %s38_s15  }
  0x10   : > { %p610_p11 = por %p83_p10, %p51_p3  ;;  %p372_p13 = scmp.lt.s32.totalorder %s540_s11, 2 }
  0x11   : > { %s103_s22 = sand.u32 1, %s528_s8   ;;  %s358_s24 = sshll.u32 %s536_s10, 3 }
  0x12   : > { %s347_s23 = sshll.u32 %s103_s22, 3  ;;  %s114_s27 = scalar_lea.hbm %s688_s0, %s358_s24 }
  0x13   : > { %s107_s28 = scalar_lea.vmem [#allocation2], %s347_s23  ;;  %s116_s30 = sshll.u32 %s114_s27, 4  ;;  %s117_s30 = int_to_ptr.hbm [resolvable:$true] %s116_s30 }
  0x14   : > { %s118_s29 = sshll.u32 %s107_s28, 4  ;;  %p365_p0 = pnand %p372_p13, %p593_p4  ;;  %s119_s29 = int_to_ptr.vmem [resolvable:$true] %s118_s29 }
  0x15   : > { %p350_p1 = scmp.ge.s32.totalorder %s540_s11, 1  ;;  %p123_p2 = scmp.lt.s32.totalorder %s540_s11, 3 }
  0x16   : > { %s104_s2 = scalar_lea.sflag [#allocation3], %s103_s22 }
  0x17   : > { %367 = dma.hbm_to_vmem [thread:$0]  (!%p365_p0), %s117_s30, 128, %s119_s29, %s104_s2  }
  0x18   : > { %p124_p3 = pnand %p350_p1, %p123_p2 }
  0x19   : > { %s626_s3 = sand.u32 (!%p124_p3), 1, %s524_s7  }
  0x1a   : > { %127 = sbr.rel (%p124_p3) target bundleno = 115 (0x73), region = 24  ;;  %s351_s4 = sshll.u32 (!%p124_p3), %s626_s3, 3 }
  0x1b   : > { %s130_s5 = scalar_lea.sflag (!%p124_p3), [#allocation3], %s626_s3  ;;  %s133_s12 = scalar_lea.vmem (!%p124_p3), [#allocation2], %s351_s4 }
  0x1f   : > { %511 = dma.done.wait (%p599_p8), %s130_s5, 128  }
  0x20   : > { %513 = vsyncadd (%p599_p8), %s130_s5, 4294967168  ;;  %v155_v0 = vld [vmem:[%s133_s12] sm:$0xff]  ;;  %vm162_vm0 = vcmask 1043456   ;;  %s359_s13 = sshll.u32 %s532_s9, 3  ;;  %s152_s9 = scalar_lea.vmem [#allocation5], %s351_s4 }
  0x21   : > { %157 = vst [vmem:[#allocation1] ss:$2 sm:$0xff] %v155_v0  ;;  %s254_s17 = scalar_lea.hbm %s689_s1, %s359_s13  ;;  %s256_s18 = sshll.u32 %s152_s9, 4  ;;  %s257_s18 = int_to_ptr.vmem [resolvable:$true] %s256_s18 }
  0x22   : > { %s258_s22 = sshll.u32 %s254_s17, 4  ;;  %s241_s23 = scalar_lea.sflag [#allocation4], %s626_s3  ;;  %s259_s22 = int_to_ptr.hbm [resolvable:$true] %s258_s22 }
  0x23   : > { %s472_s24 = sshra.s32 %s259_s22, 4  ;;  %s478_s28 = scalar_lea.hbm %s689_s1, 16  ;;  %s473_s24 = int_to_ptr.hbm [resolvable:$true] %s472_s24 }
  0x24   : > { %s474_s25 = scalar_lea.hbm %s473_s24, 8  ;;  %p479_p7 = scmp.lt.s32.totalorder %s473_s24, %s689_s1 }
  0x25   : > { %p475_p4 = scmp.ne.s32.totalorder %s473_s24, %s474_s25  ;;  %p480_p8 = scmp.lt.s32.totalorder %s478_s28, %s474_s25 }
  0x27   : > { %p476_p5 = pnand %p475_p4, %p603_p9  ;;  %p481_p10 = por %p480_p8, %p479_p7 }
  0x28   : > { %v158_v1 = vld.sshfl [vmem:[#allocation1] sm:$0xff pattern:$0x75316420]  ;;  %v159_v2 = vld.sshfl [vmem:[#allocation1 + $0x8] sm:$0xff pattern:$0x75316420] }
  0x29   : > { %v163_v3 = vsel %vm162_vm0, %v158_v1, -inf  ;;  %v170_v4 = vsel %vm162_vm0, %v159_v2, -inf  ;;  %p477_p6 = pneg %p476_p5 }
  0x2a   : > { %v164_v5 = vrot.slane %v163_v3, 4  ;;  %v171_v6 = vrot.slane %v170_v4, 4 }
  0x2b   : > { %p482_p13 = pnand %p481_p10, %p477_p6 }
  0x2c   : > { %v165_v7 = vmax.f32 %v163_v3, %v164_v5  ;;  %v172_v8 = vmax.f32 %v170_v4, %v171_v6 }
  0x2e   : > { %v166_v9 = vrot.slane %v165_v7, 2  ;;  %v173_v10 = vrot.slane %v172_v8, 2 }
  0x30   : > { %v167_v11 = vmax.f32 %v165_v7, %v166_v9  ;;  %v174_v12 = vmax.f32 %v172_v8, %v173_v10 }
  0x32   : > { %v168_v13 = vrot.slane %v167_v11, 1  ;;  %v175_v14 = vrot.slane %v174_v12, 1 }
  0x34   : > { %v176_v15 = vmax.f32 %v174_v12, %v175_v14  ;;  %v169_v16 = vmax.f32 %v167_v11, %v168_v13 }
  0x36   : > { %v179_v17 = vrot.slane %v176_v15, 4 }
  0x38   : > { %v180_v18 = vsel %vm162_vm0, %v169_v16, %v179_v17 }
  0x39   : > { %v182_v19 = vsub.f32 %v155_v0, %v180_v18 }
  0x3b   : > { %v183_v20 = vmul.f32 1.442695, %v182_v19 }
  0x3d   : > { %422 = vpow2.f32 %v183_v20 }
  0x43   : > { %v423_v21 = vpop.eup %422 }
  0x44   : > { %186 = vst [vmem:[#allocation1] ss:$2 sm:$0xff] %v423_v21 }
  0x4b   : > { %v187_v22 = vld.sshfl [vmem:[#allocation1] sm:$0xff pattern:$0x75316420]  ;;  %v188_v23 = vld.sshfl [vmem:[#allocation1 + $0x8] sm:$0xff pattern:$0x75316420] }
  0x4c   : > { %v191_v24 = vsel %vm162_vm0, %v187_v22, 0.0  ;;  %v198_v25 = vsel %vm162_vm0, %v188_v23, 0.0 }
  0x4d   : > { %v192_v26 = vrot.slane %v191_v24, 4  ;;  %v199_v27 = vrot.slane %v198_v25, 4 }
  0x4f   : > { %v193_v28 = vadd.f32 %v192_v26, %v191_v24  ;;  %v200_v29 = vadd.f32 %v199_v27, %v198_v25 }
  0x51   : > { %v194_v30 = vrot.slane %v193_v28, 2  ;;  %v201_v31 = vrot.slane %v200_v29, 2 }
  0x53   : > { %v195_v32 = vadd.f32 %v194_v30, %v193_v28  ;;  %v202_v33 = vadd.f32 %v201_v31, %v200_v29 }
  0x55   : > { %v196_v34 = vrot.slane %v195_v32, 1  ;;  %v203_v35 = vrot.slane %v202_v33, 1 }
  0x57   : > { %v197_v36 = vadd.f32 %v196_v34, %v195_v32  ;;  %v204_v37 = vadd.f32 %v203_v35, %v202_v33 }
  0x59   : > { %424 = vrcp.f32 %v197_v36  ;;  %v230_v45 = vand.u32 2147483648, %v204_v37  ;;  %v228_v47 = vand.u32 2147483647, %v204_v37  ;;  %vm210_vm3 = vweird.f32 %v197_v36 }
  0x5a   : > { %426 = vrcp.f32 %v204_v37  ;;  %v216_v49 = vand.u32 2147483648, %v197_v36  ;;  %v214_v51 = vand.u32 2147483647, %v197_v36  ;;  %vm224_vm5 = vweird.f32 %v204_v37 }
  0x5b   : > { %v231_v53 = vor.u32 1.1754944e-38, %v230_v45  ;;  %vm229_vm7 = vcmp.eq.f32.partialorder %v228_v47, 8.507059e+37 }
  0x5c   : > { %v217_v56 = vor.u32 1.1754944e-38, %v216_v49  ;;  %vm215_vm8 = vcmp.eq.f32.partialorder %v214_v51, 8.507059e+37 }
  0x5f   : > { %v425_v38 = vpop.eup %424 }
  0x60   : > { %v427_v39 = vpop.eup %426  ;;  %v206_v40 = vmul.f32 %v425_v38, %v197_v36  ;;  %vm211_vm1 = vweird.f32 %v425_v38 }
  0x61   : > { %v220_v41 = vmul.f32 %v427_v39, %v204_v37  ;;  %vm225_vm2 = vweird.f32 %v427_v39  ;;  %vm642_vm4 = vmor %vm210_vm3, %vm211_vm1 }
  0x62   : > { %v207_v42 = vsub.f32 1.0, %v206_v40  ;;  %vm226_vm6 = vmor %vm224_vm5, %vm225_vm2 }
  0x63   : > { %v221_v43 = vsub.f32 1.0, %v220_v41 }
  0x64   : > { %v208_v44 = vmul.f32 %v425_v38, %v207_v42 }
  0x65   : > { %v222_v46 = vmul.f32 %v427_v39, %v221_v43 }
  0x66   : > { %v209_v48 = vadd.f32 %v425_v38, %v208_v44 }
  0x67   : > { %v223_v52 = vadd.f32 %v427_v39, %v222_v46 }
  0x68   : > { %v213_v54 = vsel %vm642_vm4, %v425_v38, %v209_v48 }
  0x69   : > { %v227_v55 = vsel %vm226_vm6, %v427_v39, %v223_v52  ;;  %v218_v59 = vsel %vm215_vm8, %v217_v56, %v213_v54 }
  0x6a   : > { %v232_v57 = vsel %vm229_vm7, %v231_v53, %v227_v55 }
  0x6b   : > { %v235_v58 = vrot.slane %v232_v57, 4 }
  0x6d   : > { %v236_v60 = vsel %vm162_vm0, %v218_v59, %v235_v58 }
  0x6e   : > { %v238_v61 = vmul.f32 %v423_v21, %v236_v60 }
  0x70   : > { %239 = vst [vmem:[%s152_s9] sm:$0xff] %v238_v61 }
  0x71   : > { %485 = shalt.err (!%p482_p13)
}
  0x72   : > { %362 = dma.vmem_to_hbm [thread:$0]  (%p603_p9), %s257_s18, 128, %s259_s22, %s241_s23  }
  0x73 PF: > { %s270_s2 = sand.u32 1, %s520_s6   ;;  %p369_p0 = pnand %p346_p12, %p610_p11 }
  0x74   : > { %s271_s3 = scalar_lea.sflag [#allocation4], %s270_s2 }
  0x75   : > { %p370_p1 = pneg %p369_p0 }
  0x77   : > { %515 = dma.done.wait (%p370_p1), %s271_s3, 128  }
  0x78   : > { %517 = vsyncadd (%p370_p1), %s271_s3, 4294967168  ;;  %s17_s11 = sadd.s32 1, %s540_s11   ;;  %s696_s6 = smov %s524_s7 }
  0x79   : > { %p14_p2 = scmp.ge.s32.totalorder %s17_s11, 4   ;;  %s697_s7 = smov %s528_s8 }
  0x7a   : > { %s698_s8 = smov %s608_s20  ;;  %s699_s9 = smov %s536_s10 }
  0x7b   : > { %s700_s10 = smov %s702_s14  ;;  %16 = sbr.rel (!%p14_p2) target bundleno = 6 (0x6), region = 69 }
  0x80   :  { %277 = vsyncpa [#allocation3], 1 }
  0x81   :  { %279 = vsyncpa [#allocation3 + $0x1], 1 }
  0x82   :  { %280 = vsyncpa [#allocation4], 1 }
  0x83   :  { %282 = vsyncpa [#allocation4 + $0x1], 1 }

</bundles_post_ra>
